<compile_context>
chip_gen: v7x
topology: tpu7x:2x2x1
jax: 0.10.0
libtpu: 0.0.40
codegen_flags: <defaults>
</compile_context>

<pallas_src>
from functools import partial

import jax
import jax.numpy as jnp
from jax import lax
from jax.experimental import pallas as pl
from jax.experimental.pallas import tpu as pltpu


_LANES = 128
_ROW_GRANULE = 64                    # multiple of every sublane packing (8/16/32)
_BLOCK_BYTE_BUDGET = 4 * 1024 * 1024  # ~4 MiB of input per grid step
_SMALL_INPUT_ELEMS = 512 * 1024       # below this, XLA's fused reduce wins


def _round_down(x, m):
    return (x // m) * m


def _reduce_tile(tile):
    """(block_rows, 128) f32 -> (8, 128) partial sum (ILP-friendly, 2-stage)."""
    # Stage 1: 8 independent (8,128) accumulator chains -> (64, 128).
    s = jnp.sum(tile.reshape(-1, _ROW_GRANULE, _LANES), axis=0)
    # Stage 2: 7 vreg adds -> (8, 128).
    return jnp.sum(s.reshape(8, 8, _LANES), axis=0)


def _partial_sum_kernel(x_ref, o_ref, *, tail_rows):
    """Reduce one (block_rows, 128) tile into one (8, 128) f32 output slot."""
    if tail_rows == 0:
        # Every block is full: single unmasked fast path.
        o_ref[...] = _reduce_tile(x_ref[...].astype(jnp.float32))
    else:
        last = pl.num_programs(0) - 1

        @pl.when(pl.program_id(0) < last)
        def _():
            o_ref[...] = _reduce_tile(x_ref[...].astype(jnp.float32))

        @pl.when(pl.program_id(0) == last)
        def _():
            # Last block is partial: Pallas pads it with unspecified data, so
            # zero the invalid rows (tail_rows is a static Python int).
            tile = x_ref[...].astype(jnp.float32)
            row_ids = lax.broadcasted_iota(jnp.int32, tile.shape, 0)
            tile = jnp.where(row_ids < tail_rows, tile, 0.0)
            o_ref[...] = _reduce_tile(tile)


def loss_forward(x_fake, reg=1.0, *,
                 block_byte_budget=_BLOCK_BYTE_BUDGET,
                 min_pallas_elems=_SMALL_INPUT_ELEMS):
    """Pallas equivalent of Loss.forward: reg * compute(x).mean(), compute = id."""
    x_fake = jnp.asarray(x_fake)
    n = x_fake.size
    flat = jnp.ravel(x_fake)
    itemsize = jnp.dtype(x_fake.dtype).itemsize
    rows = n // _LANES

    use_pallas = (
        n >= max(min_pallas_elems, 1)
        and (n % _LANES) == 0          # full-array reshape is a free bitcast
        and rows >= _ROW_GRANULE       # guarantees block <= array extent
        and itemsize in (1, 2, 4)      # byte-sized dtypes only (no int4 etc.)
    )

    if not use_pallas:
        # Small inputs / lane remainders / exotic dtypes: XLA's fused reduce
        # avoids both the Pallas fixed overhead and any hidden slice copy.
        mean = jnp.mean(flat.astype(jnp.float32))
        return (jnp.asarray(reg, jnp.float32) * mean).astype(jnp.float32)

    x2d = flat.reshape(rows, _LANES)   # free: contiguous full-array reshape

    # Block sizing by byte budget, kept a multiple of the row granule and
    # never larger than the array (so only the trailing block can be partial).
    budget_rows = max(_ROW_GRANULE,
                      _round_down(block_byte_budget // (_LANES * itemsize),
                                  _ROW_GRANULE))
    block_rows = min(budget_rows, _round_down(rows, _ROW_GRANULE))
    num_blocks = pl.cdiv(rows, block_rows)
    tail_rows = rows % block_rows       # 0 -> fully unmasked kernel

    # VMEM budget: 2x double-buffered input + f32/iota/masked temporaries.
    block_in_bytes = block_rows * _LANES * itemsize
    block_f32_bytes = block_rows * _LANES * 4
    vmem_limit = min(2 * block_in_bytes + 3 * block_f32_bytes + (4 << 20),
                     56 * 1024 * 1024)

    partials = pl.pallas_call(
        partial(_partial_sum_kernel, tail_rows=tail_rows),
        out_shape=jax.ShapeDtypeStruct((num_blocks * 8, _LANES), jnp.float32),
        grid_spec=pltpu.PrefetchScalarGridSpec(
            num_scalar_prefetch=0,
            grid=(num_blocks,),
            in_specs=[pl.BlockSpec((block_rows, _LANES), lambda i: (i, 0))],
            out_specs=pl.BlockSpec((8, _LANES), lambda i: (i, 0)),
        ),
        compiler_params=pltpu.CompilerParams(
            dimension_semantics=("parallel",),
            vmem_limit_bytes=vmem_limit,
        ),
        cost_estimate=pl.CostEstimate(
            flops=rows * _LANES,
            transcendentals=0,
            bytes_accessed=rows * _LANES * itemsize + num_blocks * 8 * _LANES * 4,
        ),
    )(x2d)

    total = jnp.sum(partials, dtype=jnp.float32)
    mean = total / jnp.float32(n)
    return (jnp.asarray(reg, jnp.float32) * mean).astype(jnp.float32)


class Loss:
    """Thin mirror of the PyTorch module (compute = identity)."""

    def __init__(self, name, reg=1.0, threshold=10.0):
        self.name = name
        self.reg = reg
        self.threshold = threshold

    def __call__(self, x_fake):
        return loss_forward(x_fake, reg=self.reg)


if __name__ == "__main__":
    key = jax.random.PRNGKey(0)
    k1, k2, k3 = jax.random.split(key, 3)
    reg = 1.7
    loss = Loss("test", reg=reg)

    cases = []

    # 1) Canonical small NCHW fake batch -> small-input fast path.
    x_small = jax.random.normal(k1, (2, 4, 16, 16), dtype=jnp.float32)
    cases.append((x_small, {}))

    # 2) Small shape forced through the Pallas path: 2 blocks, masked tail
    #    (rows=288, block_rows=256, tail_rows=32).
    x_forced = jax.random.normal(k2, (2, 4, 36, 128), dtype=jnp.float32)
    cases.append((x_forced, dict(min_pallas_elems=0)))

    # 3) Larger input (8 MiB): default Pallas path, 2 full 4 MiB blocks,
    #    unmasked fast path, "parallel" grid axis.
    x_big = jax.random.normal(k2, (8, 16, 128, 128), dtype=jnp.float32)
    cases.append((x_big, {}))

    # 4) Non-multiple-of-128 size -> fused XLA fallback (no hidden slice copy).
    x_odd = jax.random.normal(k3, (2, 4, 16, 17), dtype=jnp.float32)
    cases.append((x_odd, dict(min_pallas_elems=0)))

    for x, kwargs in cases:
        out = jax.block_until_ready(loss_forward(x, reg=reg, **kwargs))
        ref = jnp.float32(reg) * jnp.mean(x)
        assert jnp.allclose(out, ref, atol=1e-5, rtol=1e-4), (x.shape, kwargs, out, ref)

    # Also exercise the class wrapper once.
    out = jax.block_until_ready(loss(x_small))
    ref = jnp.float32(reg) * jnp.mean(x_small)
    assert jnp.allclose(out, ref, atol=1e-5, rtol=1e-4)

    print("KERNEL_OK")
</pallas_src>

<mosaic_0001>
module attributes {stable_mosaic.version = 11 : i64} {
  func.func @_partial_sum_kernel(%arg0: i32, %arg1: memref<256x128xf32, #tpu.memory_space<vmem>>, %arg2: memref<8x128xf32, #tpu.memory_space<vmem>>) attributes {dimension_semantics = [#tpu.dimension_semantics<parallel>], iteration_bounds = array<i64: 2>, scalar_prefetch = 0 : i64, scratch_operands = 0 : i64, tpu.core_type = #tpu.core_type<tc>, window_params = [{transform_indices = @transform_0, window_bounds = array<i64: 256, 128>}, {transform_indices = @transform_1, window_bounds = array<i64: 8, 128>}]} {
    %c1_i32 = arith.constant 1 : i32
    %0 = arith.cmpi slt, %arg0, %c1_i32 : i32
    %1 = arith.extui %0 : i1 to i32
    %c0_i32 = arith.constant 0 : i32
    %2 = arith.cmpi ne, %1, %c0_i32 : i32
    scf.if %2 {
      %c0 = arith.constant 0 : index
      %c0_2 = arith.constant 0 : index
      %6 = vector.load %arg1[%c0, %c0_2] : memref<256x128xf32, #tpu.memory_space<vmem>>, vector<256x128xf32>
      %7 = vector.shape_cast %6 : vector<256x128xf32> to vector<4x64x128xf32>
      %cst = arith.constant dense<0.000000e+00> : vector<64x128xf32>
      %8 = vector.multi_reduction <add>, %7, %cst [0] : vector<4x64x128xf32> to vector<64x128xf32>
      %9 = vector.shape_cast %8 : vector<64x128xf32> to vector<8x8x128xf32>
      %cst_3 = arith.constant dense<0.000000e+00> : vector<8x128xf32>
      %10 = vector.multi_reduction <add>, %9, %cst_3 [0] : vector<8x8x128xf32> to vector<8x128xf32>
      %c0_4 = arith.constant 0 : index
      %c0_5 = arith.constant 0 : index
      %11 = vector.load %arg2[%c0_4, %c0_5] : memref<8x128xf32, #tpu.memory_space<vmem>>, vector<8x128xf32>
      tpu.vector_store %arg2[%c0_4, %c0_5], %10 {strides = array<i32>} : memref<8x128xf32, #tpu.memory_space<vmem>>, vector<8x128xf32>,
    } else {
    }
    %c1_i32_0 = arith.constant 1 : i32
    %3 = arith.cmpi eq, %arg0, %c1_i32_0 : i32
    %4 = arith.extui %3 : i1 to i32
    %c0_i32_1 = arith.constant 0 : i32
    %5 = arith.cmpi ne, %4, %c0_i32_1 : i32
    scf.if %5 {
      %c0 = arith.constant 0 : index
      %c0_2 = arith.constant 0 : index
      %6 = vector.load %arg1[%c0, %c0_2] : memref<256x128xf32, #tpu.memory_space<vmem>>, vector<256x128xf32>
      %7 = tpu.iota {dimensions = array<i32: 0>} : vector<256x128xi32>
      %c32_i32 = arith.constant 32 : i32
      %8 = vector.broadcast %c32_i32 : i32 to vector<256x128xi32>
      %9 = arith.cmpi slt, %7, %8 : vector<256x128xi32>
      %cst = arith.constant 0.000000e+00 : f32
      %10 = vector.broadcast %cst : f32 to vector<256x128xf32>
      %11 = arith.select %9, %6, %10 : vector<256x128xi1>, vector<256x128xf32>
      %12 = vector.shape_cast %11 : vector<256x128xf32> to vector<4x64x128xf32>
      %cst_3 = arith.constant dense<0.000000e+00> : vector<64x128xf32>
      %13 = vector.multi_reduction <add>, %12, %cst_3 [0] : vector<4x64x128xf32> to vector<64x128xf32>
      %14 = vector.shape_cast %13 : vector<64x128xf32> to vector<8x8x128xf32>
      %cst_4 = arith.constant dense<0.000000e+00> : vector<8x128xf32>
      %15 = vector.multi_reduction <add>, %14, %cst_4 [0] : vector<8x8x128xf32> to vector<8x128xf32>
      %c0_5 = arith.constant 0 : index
      %c0_6 = arith.constant 0 : index
      %16 = vector.load %arg2[%c0_5, %c0_6] : memref<8x128xf32, #tpu.memory_space<vmem>>, vector<8x128xf32>
      tpu.vector_store %arg2[%c0_5, %c0_6], %15 {strides = array<i32>} : memref<8x128xf32, #tpu.memory_space<vmem>>, vector<8x128xf32>,
    } else {
    }
    return
  }
  func.func @transform_0(%arg0: i32) -> (i32, i32) {
    %c0_i32 = arith.constant 0 : i32
    %c0_i32_0 = arith.constant 0 : i32
    return %arg0, %c0_i32 : i32, i32
  }
  func.func @transform_1(%arg0: i32) -> (i32, i32) {
    %c0_i32 = arith.constant 0 : i32
    %c0_i32_0 = arith.constant 0 : i32
    return %arg0, %c0_i32 : i32, i32
  }
}

</mosaic_0001>

<bundles_post_ra>
// kernel: tpu_custom_call.1
= control target key start
LH: loop header
LB: loop body
LE: loop exit
PB: predicated region body
PF: predicated region fallthrough
CT: control target
= control target key end

     0   :  { %6 = vsyncpa [#allocation3], 0  ;;  %s831_s0 = inlined_call_operand.hbm [shape: f32[288,128], index: 0, kind: input, shape index: {}]   ;;  %s832_s1 = inlined_call_operand.hbm [shape: f32[16,128], index: 1, kind: output, shape index: {}]  }
   0x1   :  { %8 = vsyncpa [#allocation3 + $0x1], 0 }
   0x2   :  { %9 = vsyncpa [#allocation4], 0 }
   0x3   :  { %11 = vsyncpa [#allocation4 + $0x1], 0  ;;  %s635_s6 = smov 0   ;;  %s637_s7 = smov 0  }
   0x4   :  { %s639_s8 = smov 0   ;;  %s641_s9 = smov 0  }
   0x5 LB: > { %s656_s10 = sadd.s32 4294967295, %s619_s9   ;;  %s463_s11 = sadd.s32 4294967294, %s619_s9   ;;  %s619_s9 = sphi %s641_s9, %s842_s9   ;;  %s615_s8 = sphi %s639_s8, %s841_s8   ;;  %s611_s7 = sphi %s637_s7, %s840_s7   ;;  %s607_s6 = sphi %s635_s6, %s839_s6  }
   0x6   : > { %s660_s12 = sadd.s32 1, %s619_s9   ;;  %s24_s13 = sadd.s32 1, %s615_s8 }
   0x7   : > { %s21_s14 = ssub.s32 %s619_s9, %s660_s12  ;;  %p31_p0 = scmp.ne.s32.totalorder %s615_s8, %s611_s7 }
   0x8   : > { %p22_p1 = scmp.eq.s32.totalorder %s21_s14, 0  ;;  %p32_p2 = scmp.eq.s32.totalorder %s619_s9, 0 }
   0x9   : > { %p37_p3 = scmp.ne.s32.totalorder %s611_s7, %s607_s6  ;;  %p38_p4 = scmp.eq.s32.totalorder %s656_s10, 0 }
   0xa   : > { %s672_s15 = scalar_select %p22_p1, %s615_s8, %s24_s13  }
   0xb   : > { %p33_p5 = por %p32_p2, %p31_p0  ;;  %p674_p6 = por %p38_p4, %p37_p3 }
   0xc   : > { %p61_p7 = scmp.eq.s32.totalorder %s656_s10, 1  ;;  %p67_p8 = scmp.eq.s32.totalorder %s463_s11, 1 }
   0xd   : > { %p833_p11 = scmp.ge.s32.totalorder %s619_s9, 2 }
   0xe   : > { %p679_p9 = por %p61_p7, %p31_p0  ;;  %p683_p10 = por %p67_p8, %p37_p3 }
   0xf   : > { %83 = sbr.rel (%p833_p11) target bundleno = 57 (0x39), region = 16 }
  0x10   : > { %s836_s18 = scalar_select %p683_p10, 1, 0 }
  0x16   : > { %86 = sbr.rel (!%p33_p5) target bundleno = 57 (0x39), region = 20  ;;  %s87_s19 = sand.u32 (%p33_p5), 1, %s615_s8  }
  0x17   : > { %s467_s20 = sshll.u32 (%p33_p5), %s619_s9, 5  ;;  %s466_s21 = sshll.u32 (%p33_p5), %s87_s19, 8 }
  0x18   : > { %s93_s22 = ssub.s32 (%p33_p5), 36, %s467_s20  ;;  %s695_s25 = scalar_lea.sflag (%p33_p5), [#allocation3], %s87_s19 }
  0x19   : > { %p94_p12 = scmp.lt.s32.totalorder (%p33_p5), %s93_s22, 32  ;;  %s91_s26 = scalar_lea.vmem (%p33_p5), [#allocation2], %s466_s21 }
  0x1d   : > { %s844_s22 = smov (!%p94_p12, %s93_s22), 32 }
  0x1e   : > { %s692_s23 = sshll.u32 %s844_s22, 7 }
  0x1f   : > { %s98_s24 = ssub.s32 4096, %s692_s23 }
  0x20   : > { %99 = vsyncadd %s695_s25, %s98_s24  ;;  %p469_p13 = scmp.ne.s32.totalorder %s692_s23, 0  ;;  %s482_s27 = sshll.u32 %s619_s9, 12 }
  0x21   : > { %s703_s30 = scalar_lea.hbm %s831_s0, %s482_s27  ;;  %s104_s2 = sshll.u32 %s91_s26, 4  ;;  %s705_s2 = int_to_ptr.vmem [resolvable:$true] %s104_s2 }
  0x22   : > { %s525_s3 = scalar_lea.hbm %s703_s30, %s692_s23  ;;  %s529_s11 = scalar_lea.hbm %s831_s0, 4608 }
  0x23   : > { %p526_p0 = scmp.ne.s32.totalorder %s703_s30, %s525_s3  ;;  %p530_p3 = scmp.lt.u32.totalorder %s703_s30, %s831_s0 }
  0x24   : > { %p531_p4 = scmp.lt.u32.totalorder %s529_s11, %s525_s3  ;;  %p533_p7 = scmp.lt.u32.totalorder %s525_s3, %s703_s30 }
  0x25   : > { %p527_p1 = pnand %p526_p0, %p469_p13 }
  0x26   : > { %p532_p5 = por %p531_p4, %p530_p3 }
  0x27   : > { %p528_p2 = pneg %p527_p1 }
  0x28   : > { %p534_p8 = por %p533_p7, %p532_p5 }
  0x2a   : > { %p535_p12 = pnand %p534_p8, %p528_p2 }
  0x2c   : > { %538 = shalt.err (!%p535_p12)
}
  0x2d   : > { %s539_s19 = scalar_lea.vmem %s705_s2, %s692_s23  ;;  %s621_s20 = smov [#allocation2]  }
  0x2e   : > { %p540_p0 = scmp.ne.s32.totalorder %s705_s2, %s539_s19  ;;  %s543_s21 = sshll.u32 %s621_s20, 4  ;;  %s544_s21 = int_to_ptr.vmem [resolvable:$false] %s543_s21 }
  0x2f   : > { %s545_s22 = scalar_lea.vmem %s544_s21, 8192  ;;  %p546_p10 = scmp.lt.s32.totalorder %s705_s2, %s544_s21 }
  0x30   : > { %p541_p1 = pnand %p540_p0, %p469_p13  ;;  %p547_p3 = scmp.lt.s32.totalorder %s545_s22, %s539_s19 }
  0x32   : > { %p542_p11 = pneg %p541_p1  ;;  %p548_p4 = por %p547_p3, %p546_p10 }
  0x34   : > { %p549_p5 = pnand %p548_p4, %p542_p11 }
  0x36   : > { %552 = shalt.err (!%p549_p5)
}
  0x37   : > { %s622_s24 = smov 128   ;;  %s623_s26 = smov 8  }
  0x38   : > { %110 = dma.hbm_to_vmem [thread:$0]  (%p469_p13), %s703_s30, %s692_s23, %s705_s2, %s695_s25, %s622_s24, %s622_s24, %s623_s26  }
  0x39 PF: > { %p473_p2 = scmp.ge.s32.totalorder %s619_s9, 1  ;;  %p112_p7 = scmp.lt.s32.totalorder %s619_s9, 3 }
  0x3b   : > { %p113_p8 = pnand %p473_p2, %p112_p7 }
  0x3c   : > { %s735_s27 = sand.u32 (!%p113_p8), 1, %s611_s7  }
  0x3d   : > { %116 = sbr.rel (%p113_p8) target bundleno = 128 (0x80), region = 24  ;;  %s474_s28 = sshll.u32 (!%p113_p8), %s735_s27, 8 }
  0x3e   : > { %s119_s29 = scalar_lea.sflag (!%p113_p8), [#allocation3], %s735_s27  ;;  %s739_s3 = scalar_lea.vmem (!%p113_p8), [#allocation2], %s474_s28 }
  0x44   : > { %598 = dma.done.wait (%p674_p6), %s119_s29, 4096  }
  0x45   : > { %600 = vsyncadd (%p674_p6), %s119_s29, 4294963200  ;;  %s475_s23 = sshll.u32 %s735_s27, 3  ;;  %p476_p10 = scmp.ge.s32.totalorder %s656_s10, 1 }
  0x46   : > { %s746_s25 = scalar_lea.vmem [#allocation5], %s475_s23  ;;  %v150_v0 = vld [vmem:[%s739_s3] sm:$0xff] (!%p476_p10)  ;;  %v151_v1 = vld [vmem:[%s739_s3 + $0x8] sm:$0xff] (!%p476_p10)  ;;  %v152_v2 = vld [vmem:[%s739_s3 + $0x10] sm:$0xff] (!%p476_p10) }
  0x47   : > { %149 = sbr.rel (%p476_p10) target bundleno = 95 (0x5f), region = 32  ;;  %v153_v3 = vld [vmem:[%s739_s3 + $0x18] sm:$0xff] (!%p476_p10)  ;;  %v154_v4 = vld [vmem:[%s739_s3 + $0x20] sm:$0xff] (!%p476_p10)  ;;  %v155_v5 = vld [vmem:[%s739_s3 + $0x28] sm:$0xff] (!%p476_p10) }
  0x48   : > { %v158_v6 = vld [vmem:[%s739_s3 + $0x40] sm:$0xff] (!%p476_p10)  ;;  %v159_v7 = vld [vmem:[%s739_s3 + $0x48] sm:$0xff] (!%p476_p10)  ;;  %v160_v8 = vld [vmem:[%s739_s3 + $0x50] sm:$0xff] (!%p476_p10) }
  0x49   : > { %v161_v9 = vld [vmem:[%s739_s3 + $0x58] sm:$0xff] (!%p476_p10)  ;;  %v182_v10 = vadd.f32 (!%p476_p10), %v158_v6, %v150_v0  ;;  %v156_v11 = vld [vmem:[%s739_s3 + $0x30] sm:$0xff] (!%p476_p10)  ;;  %v162_v12 = vld [vmem:[%s739_s3 + $0x60] sm:$0xff] (!%p476_p10)  ;;  %v185_v14 = vadd.f32 (!%p476_p10), %v159_v7, %v151_v1  ;;  %v188_v15 = vadd.f32 (!%p476_p10), %v160_v8, %v152_v2 }
  0x4a   : > { %v163_v13 = vld [vmem:[%s739_s3 + $0x68] sm:$0xff] (!%p476_p10)  ;;  %v191_v16 = vadd.f32 (!%p476_p10), %v161_v9, %v153_v3  ;;  %v164_v17 = vld [vmem:[%s739_s3 + $0x70] sm:$0xff] (!%p476_p10)  ;;  %v166_v18 = vld [vmem:[%s739_s3 + $0x80] sm:$0xff] (!%p476_p10)  ;;  %v194_v20 = vadd.f32 (!%p476_p10), %v162_v12, %v154_v4 }
  0x4b   : > { %v167_v19 = vld [vmem:[%s739_s3 + $0x88] sm:$0xff] (!%p476_p10)  ;;  %v168_v21 = vld [vmem:[%s739_s3 + $0x90] sm:$0xff] (!%p476_p10)  ;;  %v169_v22 = vld [vmem:[%s739_s3 + $0x98] sm:$0xff] (!%p476_p10)  ;;  %v183_v24 = vadd.f32 (!%p476_p10), %v182_v10, %v166_v18  ;;  %v197_v31 = vadd.f32 (!%p476_p10), %v163_v13, %v155_v5  ;;  %v200_v35 = vadd.f32 (!%p476_p10), %v164_v17, %v156_v11 }
  0x4c   : > { %v170_v23 = vld [vmem:[%s739_s3 + $0xa0] sm:$0xff] (!%p476_p10)  ;;  %v186_v25 = vadd.f32 (!%p476_p10), %v185_v14, %v167_v19  ;;  %v157_v26 = vld [vmem:[%s739_s3 + $0x38] sm:$0xff] (!%p476_p10)  ;;  %v171_v28 = vld [vmem:[%s739_s3 + $0xa8] sm:$0xff] (!%p476_p10)  ;;  %v189_v29 = vadd.f32 (!%p476_p10), %v188_v15, %v168_v21  ;;  %v192_v30 = vadd.f32 (!%p476_p10), %v191_v16, %v169_v22 }
  0x4d   : > { %v165_v27 = vld [vmem:[%s739_s3 + $0x78] sm:$0xff] (!%p476_p10)  ;;  %v174_v32 = vld [vmem:[%s739_s3 + $0xc0] sm:$0xff] (!%p476_p10)  ;;  %v175_v33 = vld [vmem:[%s739_s3 + $0xc8] sm:$0xff] (!%p476_p10)  ;;  %v195_v40 = vadd.f32 (!%p476_p10), %v194_v20, %v170_v23  ;;  %v198_v44 = vadd.f32 (!%p476_p10), %v197_v31, %v171_v28 }
  0x4e   : > { %v176_v34 = vld [vmem:[%s739_s3 + $0xd0] sm:$0xff]  ;;  %v177_v36 = vld [vmem:[%s739_s3 + $0xd8] sm:$0xff]  ;;  %v184_v37 = vadd.f32 %v183_v24, %v174_v32  ;;  %v187_v38 = vadd.f32 %v186_v25, %v175_v33  ;;  %v178_v42 = vld [vmem:[%s739_s3 + $0xe0] sm:$0xff]  ;;  %v203_v45 = vadd.f32 %v165_v27, %v157_v26 }
  0x4f   : > { %v190_v39 = vadd.f32 %v189_v29, %v176_v34  ;;  %v172_v41 = vld [vmem:[%s739_s3 + $0xb0] sm:$0xff]  ;;  %v193_v43 = vadd.f32 %v192_v30, %v177_v36  ;;  %v173_v47 = vld [vmem:[%s739_s3 + $0xb8] sm:$0xff]  ;;  %v179_v48 = vld [vmem:[%s739_s3 + $0xe8] sm:$0xff]  ;;  %v196_v49 = vadd.f32 %v195_v40, %v178_v42 }
  0x50   : > { %v206_v46 = vadd.f32 %v187_v38, %v184_v37  ;;  %v201_v50 = vadd.f32 %v200_v35, %v172_v41  ;;  %v180_v52 = vld [vmem:[%s739_s3 + $0xf0] sm:$0xff]  ;;  %v199_v53 = vadd.f32 %v198_v44, %v179_v48  ;;  %v204_v54 = vadd.f32 %v203_v45, %v173_v47  ;;  %v181_v56 = vld [vmem:[%s739_s3 + $0xf8] sm:$0xff] }
  0x52   : > { %v207_v51 = vadd.f32 %v206_v46, %v190_v39  ;;  %v202_v57 = vadd.f32 %v201_v50, %v180_v52  ;;  %v205_v59 = vadd.f32 %v204_v54, %v181_v56 }
  0x54   : > { %v208_v55 = vadd.f32 %v207_v51, %v193_v43 }
  0x56   : > { %v209_v58 = vadd.f32 %v208_v55, %v196_v49 }
  0x58   : > { %v210_v60 = vadd.f32 %v209_v58, %v199_v53 }
  0x5a   : > { %v211_v61 = vadd.f32 %v210_v60, %v202_v57 }
  0x5c   : > { %v212_v62 = vadd.f32 %v211_v61, %v205_v59 }
  0x5e   : > { %213 = vst [vmem:[%s746_s25] sm:$0xff] %v212_v62 }
  0x5f PF: > { %p477_p6 = scmp.ne.s32.totalorder %s656_s10, 1 }
  0x60   : > { %v218_v63 = vld [vmem:[%s739_s3] sm:$0xff] (!%p477_p6)  ;;  %v219_v0 = vld [vmem:[%s739_s3 + $0x8] sm:$0xff] (!%p477_p6)  ;;  %v220_v1 = vld [vmem:[%s739_s3 + $0x10] sm:$0xff] (!%p477_p6) }
  0x61   : > { %217 = sbr.rel (%p477_p6) target bundleno = 104 (0x68), region = 36  ;;  %v371_v2 = vadd.f32 (!%p477_p6), %v219_v0, %v218_v63  ;;  %v221_v3 = vld [vmem:[%s739_s3 + $0x18] sm:$0xff] (!%p477_p6) }
  0x63   : > { %v372_v4 = vadd.f32 (!%p477_p6), %v371_v2, %v220_v1 }
  0x65   : > { %v373_v5 = vadd.f32 (!%p477_p6), %v372_v4, %v221_v3 }
  0x67   : > { %378 = vst [vmem:[%s746_s25] sm:$0xff] (!%p477_p6), %v373_v5 }
  0x68 PF: > { %s479_s16 = sshll.u32 %s656_s10, 7  ;;  %s393_s5 = sshll.u32 %s746_s25, 4  ;;  %s394_s5 = int_to_ptr.vmem [resolvable:$true] %s393_s5 }
  0x69   : > { %s792_s4 = scalar_lea.hbm %s832_s1, %s479_s16  ;;  %s380_s11 = scalar_lea.sflag [#allocation4], %s735_s27 }
  0x6a   : > { %s553_s13 = scalar_lea.vmem %s394_s5, 128  ;;  %s624_s14 = smov [#allocation5]  }
  0x6b   : > { %p554_p11 = scmp.ne.s32.totalorder %s394_s5, %s553_s13  ;;  %s557_s19 = sshll.u32 %s624_s14, 4  ;;  %s558_s19 = int_to_ptr.vmem [resolvable:$false] %s557_s19 }
  0x6c   : > { %s559_s20 = scalar_lea.vmem %s558_s19, 256  ;;  %p560_p0 = scmp.lt.s32.totalorder %s394_s5, %s558_s19 }
  0x6d   : > { %p555_p13 = pnand %p554_p11, %p679_p9  ;;  %p561_p1 = scmp.lt.s32.totalorder %s559_s20, %s553_s13 }
  0x6f   : > { %p556_p12 = pneg %p555_p13  ;;  %p562_p3 = por %p561_p1, %p560_p0 }
  0x71   : > { %p563_p4 = pnand %p562_p3, %p556_p12 }
  0x73   : > { %566 = shalt.err (!%p563_p4)
}
  0x74   : > { %s567_s10 = scalar_lea.hbm %s792_s4, 128  ;;  %s571_s24 = scalar_lea.hbm %s832_s1, 256 }
  0x75   : > { %p568_p5 = scmp.ne.s32.totalorder %s792_s4, %s567_s10  ;;  %p572_p8 = scmp.lt.u32.totalorder %s792_s4, %s832_s1 }
  0x76   : > { %p573_p10 = scmp.lt.u32.totalorder %s571_s24, %s567_s10  ;;  %p575_p11 = scmp.lt.u32.totalorder %s567_s10, %s792_s4 }
  0x77   : > { %p569_p2 = pnand %p568_p5, %p679_p9 }
  0x78   : > { %p574_p6 = por %p573_p10, %p572_p8 }
  0x79   : > { %p570_p7 = pneg %p569_p2 }
  0x7a   : > { %p576_p13 = por %p575_p11, %p574_p6 }
  0x7c   : > { %p577_p12 = pnand %p576_p13, %p570_p7 }
  0x7e   : > { %580 = shalt.err (!%p577_p12)
}
  0x7f   : > { %484 = dma.vmem_to_hbm [thread:$0]  (%p679_p9), %s394_s5, 128, %s792_s4, %s380_s11  }
  0x80 PF: > { %s405_s28 = sand.u32 1, %s607_s6   ;;  %p837_p0 = scmp.ne.s32.totalorder %s836_s18, 0 }
  0x81   : > { %p838_p1 = scmp.ge.s32.totalorder %s619_s9, 2  ;;  %s406_s29 = scalar_lea.sflag [#allocation4], %s405_s28 }
  0x83   : > { %p487_p3 = pnand %p838_p1, %p837_p0 }
  0x85   : > { %602 = dma.done.wait (!%p487_p3), %s406_s29, 128  }
  0x86   : > { %604 = vsyncadd (!%p487_p3), %s406_s29, 4294967168  ;;  %p14_p4 = scmp.ge.s32.totalorder %s660_s12, 4   ;;  %s839_s6 = smov %s611_s7 }
  0x87   : > { %s840_s7 = smov %s615_s8  ;;  %s841_s8 = smov %s672_s15 }
  0x88   : > { %s842_s9 = smov %s660_s12  ;;  %16 = sbr.rel (!%p14_p4) target bundleno = 5 (0x5), region = 77 }
  0x8f   :  { %411 = vsyncpa [#allocation3], 1 }
  0x90   :  { %413 = vsyncpa [#allocation3 + $0x1], 1 }
  0x91   :  { %414 = vsyncpa [#allocation4], 1 }
  0x92   :  { %416 = vsyncpa [#allocation4 + $0x1], 1 }

</bundles_post_ra>
